<compile_context>
chip_gen: v6e
topology: v6e:2x2x1
jax: 0.10.0
libtpu: 0.0.40
codegen_flags: <defaults>
</compile_context>

<pallas_src>
import jax
import jax.numpy as jnp
from jax.experimental import pallas as pl
from jax.experimental.pallas import tpu as pltpu


def _round_up(x, m):
    return ((x + m - 1) // m) * m


def mlp_kernel(x_ref, w1_ref, b1_ref, w2_ref, b2_ref, o_ref):
    # fc1: bf16 MXU matmul, f32 accumulate.
    h = jnp.dot(x_ref[...], w1_ref[...], preferred_element_type=jnp.float32)
    # Bias + ReLU on the VPU in f32.
    h = jnp.maximum(h + b1_ref[...], 0.0)
    # fc2: bf16 MXU matmul, f32 accumulate.
    out = jnp.dot(h.astype(jnp.bfloat16), w2_ref[...],
                  preferred_element_type=jnp.float32)
    # Bias + lane-dense f32 store.
    o_ref[...] = (out + b2_ref[...]).astype(o_ref.dtype)


def neural_network_forward(x, w1, b1, w2, b2, *, tm=256):
    """x: (B, D_in) f32. Returns (B, num_classes) f32."""
    B, D_in = x.shape
    H = w1.shape[1]
    C = w2.shape[1]
    assert w1.shape == (D_in, H)
    assert b1.shape == (1, H)
    assert w2.shape == (H, C)
    assert b2.shape == (1, C)

    # Batch tile: multiple of 8 sublanes, capped at `tm` (MXU rows v6e/v7x).
    TM = min(tm, _round_up(B, 8))
    B_pad = _round_up(B, TM)
    # Lane-dense output: pad num_classes up to a multiple of 128 lanes.
    C_pad = _round_up(C, 128)

    x_p = x if B_pad == B else jnp.pad(x, ((0, B_pad - B), (0, 0)))
    w2_p = w2 if C_pad == C else jnp.pad(w2, ((0, 0), (0, C_pad - C)))
    b2_p = b2 if C_pad == C else jnp.pad(b2, ((0, 0), (0, C_pad - C)))

    # bf16 on the HBM/MXU path; biases stay f32 for the VPU path.
    x_b = x_p.astype(jnp.bfloat16)
    w1_b = w1.astype(jnp.bfloat16)
    w2_b = w2_p.astype(jnp.bfloat16)
    b1_f = b1.astype(jnp.float32)
    b2_f = b2_p.astype(jnp.float32)

    grid = (B_pad // TM,)

    flops = 2 * B_pad * (D_in * H + H * C_pad)
    bytes_accessed = (x_b.size * 2 + w1_b.size * 2 + w2_b.size * 2
                      + b1_f.size * 4 + b2_f.size * 4
                      + B_pad * C_pad * 4)

    out_padded = pl.pallas_call(
        mlp_kernel,
        out_shape=jax.ShapeDtypeStruct((B_pad, C_pad), jnp.float32),
        grid=grid,
        in_specs=[
            pl.BlockSpec((TM, D_in), lambda i: (i, 0)),    # x: streamed per tile
            pl.BlockSpec((D_in, H), lambda i: (0, 0)),     # w1: VMEM resident
            pl.BlockSpec((1, H), lambda i: (0, 0)),        # b1: VMEM resident
            pl.BlockSpec((H, C_pad), lambda i: (0, 0)),    # w2: VMEM resident
            pl.BlockSpec((1, C_pad), lambda i: (0, 0)),    # b2: VMEM resident
        ],
        out_specs=pl.BlockSpec((TM, C_pad), lambda i: (i, 0)),
        compiler_params=pltpu.CompilerParams(
            dimension_semantics=("parallel",),
        ),
        cost_estimate=pl.CostEstimate(
            flops=flops, transcendentals=0, bytes_accessed=bytes_accessed),
    )(x_b, w1_b, b1_f, w2_b, b2_f)

    return out_padded[:B, :C]


if __name__ == "__main__":
    # Shapes consistent with the module: input_size=32, hidden=128 (fixed by
    # nn.Linear(input_size, 128)), num_classes=16.  batch=512 exercises the
    # batch-tiled grid (two 256-row tiles).
    batch = 512
    input_size = 32
    hidden = 128
    num_classes = 16

    key = jax.random.PRNGKey(0)
    kx, kw1, kb1, kw2, kb2 = jax.random.split(key, 5)

    x = jax.random.normal(kx, (batch, input_size), dtype=jnp.float32)
    # Deterministic parameter init (uniform, roughly matching PyTorch Linear scale)
    w1 = jax.random.uniform(kw1, (input_size, hidden), jnp.float32,
                            minval=-1.0, maxval=1.0) / jnp.sqrt(input_size)
    b1 = jax.random.uniform(kb1, (1, hidden), jnp.float32,
                            minval=-1.0, maxval=1.0) / jnp.sqrt(input_size)
    w2 = jax.random.uniform(kw2, (hidden, num_classes), jnp.float32,
                            minval=-1.0, maxval=1.0) / jnp.sqrt(hidden)
    b2 = jax.random.uniform(kb2, (1, num_classes), jnp.float32,
                            minval=-1.0, maxval=1.0) / jnp.sqrt(hidden)

    out = neural_network_forward(x, w1, b1, w2, b2)
    out = jax.block_until_ready(out)
    assert out.shape == (batch, num_classes)

    # Reference using the same bf16-in / f32-accumulate recipe the kernel uses.
    xb, w1b, w2b = (x.astype(jnp.bfloat16), w1.astype(jnp.bfloat16),
                    w2.astype(jnp.bfloat16))
    h_ref = jnp.maximum(
        jnp.dot(xb, w1b, preferred_element_type=jnp.float32) + b1, 0.0)
    ref = jnp.dot(h_ref.astype(jnp.bfloat16), w2b,
                  preferred_element_type=jnp.float32) + b2
    assert jnp.allclose(out, ref, atol=1e-4, rtol=1e-4)

    # Sanity against the pure-f32 module semantics (loose tol for bf16 inputs).
    ref_f32 = jnp.maximum(x @ w1 + b1, 0.0) @ w2 + b2
    assert jnp.allclose(out, ref_f32, atol=5e-2, rtol=5e-2)

    print("KERNEL_OK")
</pallas_src>

<mosaic_0001>
module attributes {stable_mosaic.version = 11 : i64} {
  func.func @mlp_kernel(%arg0: i32, %arg1: memref<256x32xbf16, #tpu.memory_space<vmem>>, %arg2: memref<32x128xbf16, #tpu.memory_space<vmem>>, %arg3: memref<1x128xf32, #tpu.memory_space<vmem>>, %arg4: memref<128x128xbf16, #tpu.memory_space<vmem>>, %arg5: memref<1x128xf32, #tpu.memory_space<vmem>>, %arg6: memref<256x128xf32, #tpu.memory_space<vmem>>) attributes {dimension_semantics = [#tpu.dimension_semantics<parallel>], iteration_bounds = array<i64: 2>, scalar_prefetch = 0 : i64, scratch_operands = 0 : i64, tpu.core_type = #tpu.core_type<tc>, window_params = [{transform_indices = @transform_0, window_bounds = array<i64: 256, 32>}, {pipeline_mode = #tpu.pipeline_mode<synchronous>, transform_indices = @transform_1, window_bounds = array<i64: 32, 128>}, {pipeline_mode = #tpu.pipeline_mode<synchronous>, transform_indices = @transform_2, window_bounds = array<i64: 1, 128>}, {pipeline_mode = #tpu.pipeline_mode<synchronous>, transform_indices = @transform_3, window_bounds = array<i64: 128, 128>}, {pipeline_mode = #tpu.pipeline_mode<synchronous>, transform_indices = @transform_4, window_bounds = array<i64: 1, 128>}, {transform_indices = @transform_5, window_bounds = array<i64: 256, 128>}]} {
    %c0 = arith.constant 0 : index
    %c0_0 = arith.constant 0 : index
    %0 = vector.load %arg1[%c0, %c0_0] : memref<256x32xbf16, #tpu.memory_space<vmem>>, vector<256x32xbf16>
    %c0_1 = arith.constant 0 : index
    %c0_2 = arith.constant 0 : index
    %1 = vector.load %arg2[%c0_1, %c0_2] : memref<32x128xbf16, #tpu.memory_space<vmem>>, vector<32x128xbf16>
    %cst = arith.constant dense<0.000000e+00> : vector<256x128xf32>
    %2 = tpu.matmul %0, %1, %cst {dimension_numbers = #tpu.dot_dimension_numbers<[1], [0], [0], [1], [0, 0, 1, 1], [], []>} : vector<256x32xbf16>, vector<32x128xbf16>, vector<256x128xf32> -> vector<256x128xf32>
    %c0_3 = arith.constant 0 : index
    %c0_4 = arith.constant 0 : index
    %3 = vector.load %arg3[%c0_3, %c0_4] : memref<1x128xf32, #tpu.memory_space<vmem>>, vector<1x128xf32>
    %4 = vector.broadcast %3 : vector<1x128xf32> to vector<256x128xf32>
    %5 = arith.addf %2, %4 : vector<256x128xf32>
    %cst_5 = arith.constant 0.000000e+00 : f32
    %6 = vector.broadcast %cst_5 : f32 to vector<256x128xf32>
    %7 = arith.maximumf %5, %6 : vector<256x128xf32>
    %8 = arith.truncf %7 : vector<256x128xf32> to vector<256x128xbf16>
    %c0_6 = arith.constant 0 : index
    %c0_7 = arith.constant 0 : index
    %9 = vector.load %arg4[%c0_6, %c0_7] : memref<128x128xbf16, #tpu.memory_space<vmem>>, vector<128x128xbf16>
    %cst_8 = arith.constant dense<0.000000e+00> : vector<256x128xf32>
    %10 = tpu.matmul %8, %9, %cst_8 {dimension_numbers = #tpu.dot_dimension_numbers<[1], [0], [0], [1], [0, 0, 1, 1], [], []>} : vector<256x128xbf16>, vector<128x128xbf16>, vector<256x128xf32> -> vector<256x128xf32>
    %c0_9 = arith.constant 0 : index
    %c0_10 = arith.constant 0 : index
    %11 = vector.load %arg5[%c0_9, %c0_10] : memref<1x128xf32, #tpu.memory_space<vmem>>, vector<1x128xf32>
    %12 = vector.broadcast %11 : vector<1x128xf32> to vector<256x128xf32>
    %13 = arith.addf %10, %12 : vector<256x128xf32>
    %c0_11 = arith.constant 0 : index
    %c0_12 = arith.constant 0 : index
    %14 = vector.load %arg6[%c0_11, %c0_12] : memref<256x128xf32, #tpu.memory_space<vmem>>, vector<256x128xf32>
    tpu.vector_store %arg6[%c0_11, %c0_12], %13 {strides = array<i32>} : memref<256x128xf32, #tpu.memory_space<vmem>>, vector<256x128xf32>,
    return
  }
  func.func @transform_0(%arg0: i32) -> (i32, i32) {
    %c0_i32 = arith.constant 0 : i32
    %c0_i32_0 = arith.constant 0 : i32
    return %arg0, %c0_i32 : i32, i32
  }
  func.func @transform_1(%arg0: i32) -> (i32, i32) {
    %c0_i32 = arith.constant 0 : i32
    %c0_i32_0 = arith.constant 0 : i32
    %c0_i32_1 = arith.constant 0 : i32
    return %c0_i32, %c0_i32_0 : i32, i32
  }
  func.func @transform_2(%arg0: i32) -> (i32, i32) {
    %c0_i32 = arith.constant 0 : i32
    %c0_i32_0 = arith.constant 0 : i32
    %c0_i32_1 = arith.constant 0 : i32
    return %c0_i32, %c0_i32_0 : i32, i32
  }
  func.func @transform_3(%arg0: i32) -> (i32, i32) {
    %c0_i32 = arith.constant 0 : i32
    %c0_i32_0 = arith.constant 0 : i32
    %c0_i32_1 = arith.constant 0 : i32
    return %c0_i32, %c0_i32_0 : i32, i32
  }
  func.func @transform_4(%arg0: i32) -> (i32, i32) {
    %c0_i32 = arith.constant 0 : i32
    %c0_i32_0 = arith.constant 0 : i32
    %c0_i32_1 = arith.constant 0 : i32
    return %c0_i32, %c0_i32_0 : i32, i32
  }
  func.func @transform_5(%arg0: i32) -> (i32, i32) {
    %c0_i32 = arith.constant 0 : i32
    %c0_i32_0 = arith.constant 0 : i32
    return %arg0, %c0_i32 : i32, i32
  }
}

</mosaic_0001>

<bundles_post_ra>
// kernel: tpu_custom_call.1
= control target key start
LH: loop header
LB: loop body
LE: loop exit
PB: predicated region body
PF: predicated region fallthrough
CT: control target
= control target key end

     0   :  { %10 = vsyncpa [#allocation3], 0  ;;  %s1599_s0 = inlined_call_operand.vmem [shape: bf16[512,32], index: 0, kind: input, shape index: {}]   ;;  %s1600_s1 = inlined_call_operand.vmem [shape: bf16[32,128], index: 1, kind: input, shape index: {}]   ;;  %s1601_s2 = inlined_call_operand.vmem [shape: f32[1,128], index: 2, kind: input, shape index: {}]   ;;  %s1602_s3 = inlined_call_operand.vmem [shape: bf16[128,128], index: 3, kind: input, shape index: {}]   ;;  %s1603_s4 = inlined_call_operand.vmem [shape: f32[1,128], index: 4, kind: input, shape index: {}]   ;;  %s1604_s5 = inlined_call_operand.hbm [shape: f32[512,128], index: 5, kind: output, shape index: {}]  }
   0x1   :  { %12 = vsyncpa [#allocation3 + $0x1], 0  ;;  %s1321_s18 = smov 0   ;;  %s1323_s19 = smov 0  }
   0x2   :  { %s1325_s20 = smov 0   ;;  %s1327_s21 = smov 0  }
   0x3 LB: > { %s1342_s22 = sadd.s32 4294967295, %s1286_s21   ;;  %s960_s23 = sadd.s32 4294967294, %s1286_s21   ;;  %s1286_s21 = sphi %s1327_s21, %s1610_s21   ;;  %s1282_s20 = sphi %s1325_s20, %s1609_s20   ;;  %s1278_s19 = sphi %s1323_s19, %s1608_s19   ;;  %s1274_s18 = sphi %s1321_s18, %s1607_s18  }
   0x4   : > { %s1346_s24 = sadd.s32 1, %s1286_s21   ;;  %s135_s25 = sadd.s32 1, %s1282_s20 }
   0x5   : > { %s132_s26 = ssub.s32 %s1286_s21, %s1346_s24  ;;  %p145_p0 = scmp.ne.s32.totalorder %s1282_s20, %s1278_s19 }
   0x6   : > { %p133_p1 = scmp.eq.s32.totalorder %s132_s26, 0  ;;  %p146_p2 = scmp.eq.s32.totalorder %s1342_s22, 1 }
   0x7   : > { %p151_p3 = scmp.ne.s32.totalorder %s1278_s19, %s1274_s18  ;;  %p152_p4 = scmp.eq.s32.totalorder %s960_s23, 1 }
   0x8   : > { %s1357_s27 = scalar_select %p133_p1, %s1282_s20, %s135_s25  }
   0x9   : > { %p1359_p5 = por %p146_p2, %p145_p0  ;;  %p1363_p6 = por %p152_p4, %p151_p3 }
   0xa   : > { %p963_p7 = scmp.ge.s32.totalorder %s1286_s21, 1  ;;  %p191_p8 = scmp.lt.s32.totalorder %s1286_s21, 3 }
   0xc   : > { %p192_p9 = pnand %p963_p7, %p191_p8 }
   0xd   : > { %s965_s7 = sshll.u32 (!%p192_p9), %s1342_s22, 5  ;;  %s216_s16 = sand.u32 (!%p192_p9), 1, %s1278_s19  }
   0xe   : > { %195 = sbr.rel (%p192_p9) target bundleno = 505 (0x1f9), region = 40  ;;  %p220_p10 = scmp.lt.s32.totalorder (!%p192_p9), %s965_s7, 63 }
   0xf   : > { %s1016_s30 = sshll.u32 (!%p192_p9), %s1342_s22, 12  ;;  %s1559_s22 = scalar_lea.sflag (!%p192_p9), [#allocation3], %s216_s16 }
  0x10   : > { %s1550_s9 = scalar_lea.hbm (!%p192_p9), %s1604_s5, %s1016_s30  ;;  %s1288_s11 = smov (!%p192_p9), [#allocation2]  }
  0x11   : > { %s1230_s12 = sshll.u32 (!%p192_p9), %s1288_s11, 4  ;;  %s1231_s12 = int_to_ptr.vmem [resolvable:$false] %s1230_s12 }
  0x12   : > { %s1232_s13 = scalar_lea.vmem (!%p192_p9), %s1231_s12, 8192 }
  0x13   : > { %v1200_v0 = vld [vmem:[%s1600_s1 + $0x8] sm:$0xff]   ;;  %v1201_v1 = vld [vmem:[%s1600_s1] sm:$0xff]   ;;  %v1218_v2 = vld [vmem:[%s1602_s3 + $0x38] sm:$0xff]   ;;  %s1612_s7 = smov (!%p220_p10, %s965_s7), 63  ;;  %vm362_vm0 = vcmask 261120  }
  0x14   : > { %1059 = vmatprep.subr.bf16.mxu0 %v1200_v0  ;;  %v1219_v3 = vld [vmem:[%s1602_s3 + $0x30] sm:$0xff]   ;;  %1143 = vmatprep.subr.bf16.mxu1 %v1218_v2  ;;  %s966_s14 = sshll.u32 %s1612_s7, 2  ;;  %v1220_v4 = vld [vmem:[%s1602_s3 + $0x28] sm:$0xff]   ;;  %v1221_v8 = vld [vmem:[%s1602_s3 + $0x20] sm:$0xff]  }
  0x15   : > { %1060 = vmatpush3.bf16.msra.mxu0 %v1200_v0  ;;  %1151 = vmatpush3.bf16.msra.mxu1 %v1218_v2  ;;  %s1385_s17 = scalar_lea.vmem %s1599_s0, %s966_s14  ;;  %v1222_v11 = vld [vmem:[%s1602_s3 + $0x18] sm:$0xff]   ;;  %v1223_v23 = vld [vmem:[%s1602_s3 + $0x10] sm:$0xff]   ;;  %v1224_v24 = vld [vmem:[%s1602_s3 + $0x8] sm:$0xff]  }
  0x16   : > { %1061 = vmatprep.subr.bf16.mxu0 %v1201_v1  ;;  %1144 = vmatprep.subr.bf16.mxu1 %v1219_v3  ;;  %v1202_v5 = vld [vmem:[%s1385_s17] sm:$0xff]   ;;  %v1203_v6 = vld [vmem:[%s1385_s17 + $0x8] sm:$0xff]   ;;  %v1204_v7 = vld [vmem:[%s1385_s17 + $0x10] sm:$0xff]  }
  0x17   : > { %1063 = vmatprep.mubr.msk.bf16.mxu0 %vm362_vm0, %v1202_v5  ;;  %v1205_v9 = vld [vmem:[%s1385_s17 + $0x18] sm:$0xff]   ;;  %v1206_v10 = vld [vmem:[%s1385_s17 + $0x20] sm:$0xff]   ;;  %v1207_v12 = vld [vmem:[%s1385_s17 + $0x28] sm:$0xff]  }
  0x18   : > { %v1208_v13 = vld [vmem:[%s1385_s17 + $0x30] sm:$0xff]   ;;  %v1209_v14 = vld [vmem:[%s1385_s17 + $0x38] sm:$0xff]   ;;  %v1210_v15 = vld [vmem:[%s1385_s17 + $0x40] sm:$0xff]  }
  0x19   : > { %1062 = vmatpush3.bf16.msra.mxu0 %v1201_v1  ;;  %1152 = vmatpush3.bf16.msra.mxu1 %v1219_v3  ;;  %v1211_v16 = vld [vmem:[%s1385_s17 + $0x48] sm:$0xff]   ;;  %v1212_v17 = vld [vmem:[%s1385_s17 + $0x50] sm:$0xff]   ;;  %v1213_v18 = vld [vmem:[%s1385_s17 + $0x58] sm:$0xff]  }
  0x1a   : > { %1095 = vmatprep.subr.bf16.mxu0 %v1218_v2  ;;  %1145 = vmatprep.subr.bf16.mxu1 %v1220_v4  ;;  %v1214_v19 = vld [vmem:[%s1385_s17 + $0x60] sm:$0xff]   ;;  %v1215_v20 = vld [vmem:[%s1385_s17 + $0x68] sm:$0xff]   ;;  %v1216_v21 = vld [vmem:[%s1385_s17 + $0x70] sm:$0xff]  }
  0x1b   : > { %v1217_v22 = vld [vmem:[%s1385_s17 + $0x78] sm:$0xff]   ;;  %v1225_v25 = vld [vmem:[%s1602_s3] sm:$0xff]   ;;  %s964_s17 = sshll.u32 %s216_s16, 8 }
  0x1c   : > { %1064 = vmatmul.mubr.msk.bf16.vlgmr.msra.gmra.mxu0 %vm362_vm0, %v1203_v6  ;;  %v1440_v28 = vld [vmem:[%s1601_s2] ss:$0 sm:$0xff]  ;;  %s1483_s26 = scalar_lea.vmem [#allocation2], %s964_s17 }
  0x1d   : > { %1067 = vmatprep.mubr.msk.bf16.mxu0 %vm362_vm0, %v1204_v7  ;;  %1096 = vmatpush3.bf16.msra.mxu0 %v1218_v2  ;;  %s898_s6 = sshll.u32 %s1483_s26, 4  ;;  %s1552_s6 = int_to_ptr.vmem [resolvable:$true] %s898_s6 }
  0x1e   : > { %1097 = vmatprep.subr.bf16.mxu0 %v1219_v3  ;;  %1153 = vmatpush3.bf16.msra.mxu1 %v1220_v4  ;;  %s1226_s10 = scalar_lea.vmem %s1552_s6, 4096  ;;  %p1233_p0 = scmp.lt.s32.totalorder %s1552_s6, %s1231_s12 }
  0x1f   : > { %1146 = vmatprep.subr.bf16.mxu1 %v1221_v8  ;;  %p1227_p11 = scmp.ne.s32.totalorder %s1552_s6, %s1226_s10  ;;  %p1234_p1 = scmp.lt.s32.totalorder %s1232_s13, %s1226_s10 }
  0x21   : > { %1098 = vmatpush3.bf16.msra.mxu0 %v1219_v3  ;;  %p1228_p12 = pnand %p1227_p11, %p1359_p5  ;;  %p1235_p2 = por %p1234_p1, %p1233_p0 }
  0x22   : > { %1099 = vmatprep.subr.bf16.mxu0 %v1220_v4  ;;  %1154 = vmatpush3.bf16.msra.mxu1 %v1221_v8 }
  0x23   : > { %1147 = vmatprep.subr.bf16.mxu1 %v1222_v11  ;;  %p1229_p13 = pneg %p1228_p12 }
  0x24   : > { %1068 = vmatmul.mubr.msk.bf16.gmra.mxu0 %vm362_vm0, %v1205_v9 }
  0x25   : > { %1071 = vmatprep.mubr.msk.bf16.mxu0 %vm362_vm0, %v1206_v10  ;;  %1100 = vmatpush3.bf16.msra.mxu0 %v1220_v4  ;;  %p1236_p3 = pnand %p1235_p2, %p1229_p13 }
  0x26   : > { %1101 = vmatprep.subr.bf16.mxu0 %v1221_v8  ;;  %1155 = vmatpush3.bf16.msra.mxu1 %v1222_v11 }
  0x27   : > { %1148 = vmatprep.subr.bf16.mxu1 %v1223_v23 }
  0x29   : > { %1102 = vmatpush3.bf16.msra.mxu0 %v1221_v8 }
  0x2a   : > { %1103 = vmatprep.subr.bf16.mxu0 %v1222_v11  ;;  %1156 = vmatpush3.bf16.msra.mxu1 %v1223_v23 }
  0x2b   : > { %1149 = vmatprep.subr.bf16.mxu1 %v1224_v24 }
  0x2c   : > { %1072 = vmatmul.mubr.msk.bf16.gmra.mxu0 %vm362_vm0, %v1207_v12 }
  0x2d   : > { %1075 = vmatprep.mubr.msk.bf16.mxu0 %vm362_vm0, %v1208_v13  ;;  %1104 = vmatpush3.bf16.msra.mxu0 %v1222_v11 }
  0x2e   : > { %1105 = vmatprep.subr.bf16.mxu0 %v1223_v23  ;;  %1157 = vmatpush3.bf16.msra.mxu1 %v1224_v24 }
  0x2f   : > { %1150 = vmatprep.subr.bf16.mxu1 %v1225_v25 }
  0x31   : > { %1106 = vmatpush3.bf16.msra.mxu0 %v1223_v23 }
  0x32   : > { %1107 = vmatprep.subr.bf16.mxu0 %v1224_v24  ;;  %1158 = vmatpush3.bf16.msra.mxu1 %v1225_v25 }
  0x34   : > { %1076 = vmatmul.mubr.msk.bf16.gmra.mxu0 %vm362_vm0, %v1209_v14 }
  0x35   : > { %1079 = vmatprep.mubr.msk.bf16.mxu0 %vm362_vm0, %v1210_v15  ;;  %1108 = vmatpush3.bf16.msra.mxu0 %v1224_v24 }
  0x36   : > { %1109 = vmatprep.subr.bf16.mxu0 %v1225_v25 }
  0x39   : > { %1110 = vmatpush3.bf16.msra.mxu0 %v1225_v25 }
  0x3c   : > { %1080 = vmatmul.mubr.msk.bf16.gmra.mxu0 %vm362_vm0, %v1211_v16 }
  0x3d   : > { %1083 = vmatprep.mubr.msk.bf16.mxu0 %vm362_vm0, %v1212_v17 }
  0x44   : > { %1084 = vmatmul.mubr.msk.bf16.gmra.mxu0 %vm362_vm0, %v1213_v18 }
  0x45   : > { %1087 = vmatprep.mubr.msk.bf16.mxu0 %vm362_vm0, %v1214_v19 }
  0x4c   : > { %1088 = vmatmul.mubr.msk.bf16.gmra.mxu0 %vm362_vm0, %v1215_v20 }
  0x4d   : > { %1091 = vmatprep.mubr.msk.bf16.mxu0 %vm362_vm0, %v1216_v21 }
  0x54   : > { %1092 = vmatmul.mubr.msk.bf16.gmra.mxu0 %vm362_vm0, %v1217_v22 }
  0xdc   : > { %v1065_v26 = vpop.f32.mrf.mxu0 }
  0xdd   : > { %v454_v32 = vadd.f32 %v1065_v26, %v1440_v28 }
  0xde   : > { %v445_v27 = vpop.f32.mrf.mxu0 }
  0xdf   : > { %v446_v30 = vadd.f32 %v1440_v28, %v445_v27  ;;  %v574_v39 = vmax.f32 %v454_v32, 0.0 }
  0xe0   : > { %v1066_v29 = vpop.f32.mrf.mxu0 }
  0xe1   : > { %v457_v31 = vadd.f32 %v1066_v29, %v1440_v28  ;;  %v572_v37 = vmax.f32 %v446_v30, 0.0 }
  0xe2   : > { %v448_v33 = vpop.f32.mrf.mxu0 }
  0xe3   : > { %v449_v34 = vadd.f32 %v1440_v28, %v448_v33  ;;  %v575_v35 = vmax.f32 %v457_v31, 0.0 }
  0xe4   : > { %v1069_v36 = vpop.f32.mrf.mxu0 }
  0xe5   : > { %v573_v38 = vmax.f32 %v449_v34, 0.0  ;;  %v605_v42 = vpack.c.bf16 %v575_v35, %v574_v39  ;;  %v470_v46 = vadd.f32 %v1069_v36, %v1440_v28 }
  0xe6   : > { %v461_v40 = vpop.f32.mrf.mxu0 }
  0xe7   : > { %v604_v41 = vpack.c.bf16 %v573_v38, %v572_v37  ;;  %v462_v44 = vadd.f32 %v1440_v28, %v461_v40  ;;  %v578_v53 = vmax.f32 %v470_v46, 0.0 }
  0xe8   : > { %v1070_v43 = vpop.f32.mrf.mxu0 }
  0xe9   : > { %v473_v45 = vadd.f32 %v1070_v43, %v1440_v28  ;;  %1111 = vmatprep.mubr.bf16.mxu0 %v604_v41  ;;  %v576_v51 = vmax.f32 %v462_v44, 0.0 }
  0xea   : > { %v464_v47 = vpop.f32.mrf.mxu0  ;;  %1112 = vmatmul.mubr.bf16.vlgmr.msra.gmra.mxu0 %v605_v42 }
  0xeb   : > { %v465_v48 = vadd.f32 %v1440_v28, %v464_v47  ;;  %v579_v49 = vmax.f32 %v473_v45, 0.0 }
  0xec   : > { %v1073_v50 = vpop.f32.mrf.mxu0 }
  0xed   : > { %v577_v52 = vmax.f32 %v465_v48, 0.0  ;;  %v607_v56 = vpack.c.bf16 %v579_v49, %v578_v53  ;;  %v486_v60 = vadd.f32 %v1073_v50, %v1440_v28 }
  0xee   : > { %v477_v54 = vpop.f32.mrf.mxu0 }
  0xef   : > { %v606_v55 = vpack.c.bf16 %v577_v52, %v576_v51  ;;  %v478_v58 = vadd.f32 %v1440_v28, %v477_v54  ;;  %v582_v3 = vmax.f32 %v486_v60, 0.0 }
  0xf0   : > { %v1074_v57 = vpop.f32.mrf.mxu0 }
  0xf1   : > { %v489_v59 = vadd.f32 %v1074_v57, %v1440_v28  ;;  %1115 = vmatprep.mubr.bf16.mxu1 %v606_v55  ;;  %v580_v1 = vmax.f32 %v478_v58, 0.0 }
  0xf2   : > { %v480_v61 = vpop.f32.mrf.mxu0  ;;  %1116 = vmatmul.mubr.bf16.vlgmr.msra.gmra.mxu1 %v607_v56 }
  0xf3   : > { %v481_v62 = vadd.f32 %v1440_v28, %v480_v61  ;;  %v583_v63 = vmax.f32 %v489_v59, 0.0 }
  0xf4   : > { %v1077_v0 = vpop.f32.mrf.mxu0 }
  0xf5   : > { %v581_v2 = vmax.f32 %v481_v62, 0.0  ;;  %v609_v6 = vpack.c.bf16 %v583_v63, %v582_v3  ;;  %v502_v10 = vadd.f32 %v1077_v0, %v1440_v28 }
  0xf6   : > { %v493_v4 = vpop.f32.mrf.mxu0 }
  0xf7   : > { %v608_v5 = vpack.c.bf16 %v581_v2, %v580_v1  ;;  %v494_v8 = vadd.f32 %v1440_v28, %v493_v4  ;;  %v586_v17 = vmax.f32 %v502_v10, 0.0 }
  0xf8   : > { %v1078_v7 = vpop.f32.mrf.mxu0 }
  0xf9   : > { %v505_v9 = vadd.f32 %v1078_v7, %v1440_v28  ;;  %1119 = vmatprep.mubr.bf16.mxu1 %v608_v5  ;;  %v584_v15 = vmax.f32 %v494_v8, 0.0 }
  0xfa   : > { %v496_v11 = vpop.f32.mrf.mxu0  ;;  %1120 = vmatmul.mubr.bf16.gmra.mxu1 %v609_v6 }
  0xfb   : > { %v497_v12 = vadd.f32 %v1440_v28, %v496_v11  ;;  %v587_v13 = vmax.f32 %v505_v9, 0.0 }
  0xfc   : > { %v1081_v14 = vpop.f32.mrf.mxu0 }
  0xfd   : > { %v585_v16 = vmax.f32 %v497_v12, 0.0  ;;  %v611_v20 = vpack.c.bf16 %v587_v13, %v586_v17  ;;  %v518_v24 = vadd.f32 %v1081_v14, %v1440_v28  ;;  %v1480_v12 = vld [vmem:[%s1603_s4] ss:$0 sm:$0xff] }
  0xfe   : > { %v509_v18 = vpop.f32.mrf.mxu0 }
  0xff   : > { %v610_v19 = vpack.c.bf16 %v585_v16, %v584_v15  ;;  %v510_v22 = vadd.f32 %v1440_v28, %v509_v18  ;;  %v590_v32 = vmax.f32 %v518_v24, 0.0 }
 0x100   : > { %v1082_v21 = vpop.f32.mrf.mxu0 }
 0x101   : > { %v521_v23 = vadd.f32 %v1082_v21, %v1440_v28  ;;  %1123 = vmatprep.mubr.bf16.mxu1 %v610_v19  ;;  %v588_v30 = vmax.f32 %v510_v22, 0.0 }
 0x102   : > { %v512_v25 = vpop.f32.mrf.mxu0  ;;  %1124 = vmatmul.mubr.bf16.gmra.mxu1 %v611_v20 }
 0x103   : > { %v513_v26 = vadd.f32 %v1440_v28, %v512_v25  ;;  %v591_v27 = vmax.f32 %v521_v23, 0.0 }
 0x104   : > { %v1085_v29 = vpop.f32.mrf.mxu0 }
 0x105   : > { %v589_v31 = vmax.f32 %v513_v26, 0.0  ;;  %v613_v35 = vpack.c.bf16 %v591_v27, %v590_v32  ;;  %v534_v39 = vadd.f32 %v1085_v29, %v1440_v28 }
 0x106   : > { %v525_v33 = vpop.f32.mrf.mxu0 }
 0x107   : > { %v612_v34 = vpack.c.bf16 %v589_v31, %v588_v30  ;;  %v526_v37 = vadd.f32 %v1440_v28, %v525_v33  ;;  %v594_v46 = vmax.f32 %v534_v39, 0.0 }
 0x108   : > { %v1086_v36 = vpop.f32.mrf.mxu0 }
 0x109   : > { %v537_v38 = vadd.f32 %v1086_v36, %v1440_v28  ;;  %1127 = vmatprep.mubr.bf16.mxu1 %v612_v34  ;;  %v592_v44 = vmax.f32 %v526_v37, 0.0 }
 0x10a   : > { %v528_v40 = vpop.f32.mrf.mxu0  ;;  %1128 = vmatmul.mubr.bf16.gmra.mxu1 %v613_v35 }
 0x10b   : > { %v529_v41 = vadd.f32 %v1440_v28, %v528_v40  ;;  %v595_v42 = vmax.f32 %v537_v38, 0.0 }
 0x10c   : > { %v1089_v43 = vpop.f32.mrf.mxu0 }
 0x10d   : > { %v593_v45 = vmax.f32 %v529_v41, 0.0  ;;  %v615_v49 = vpack.c.bf16 %v595_v42, %v594_v46  ;;  %v550_v53 = vadd.f32 %v1089_v43, %v1440_v28 }
 0x10e   : > { %v541_v47 = vpop.f32.mrf.mxu0 }
 0x10f   : > { %v614_v48 = vpack.c.bf16 %v593_v45, %v592_v44  ;;  %v542_v51 = vadd.f32 %v1440_v28, %v541_v47  ;;  %v598_v60 = vmax.f32 %v550_v53, 0.0 }
 0x110   : > { %v1090_v50 = vpop.f32.mrf.mxu0 }
 0x111   : > { %v553_v52 = vadd.f32 %v1090_v50, %v1440_v28  ;;  %1131 = vmatprep.mubr.bf16.mxu1 %v614_v48  ;;  %v596_v58 = vmax.f32 %v542_v51, 0.0 }
 0x112   : > { %v544_v54 = vpop.f32.mrf.mxu0  ;;  %1132 = vmatmul.mubr.bf16.gmra.mxu1 %v615_v49 }
 0x113   : > { %v545_v55 = vadd.f32 %v1440_v28, %v544_v54  ;;  %v599_v56 = vmax.f32 %v553_v52, 0.0 }
 0x114   : > { %v1093_v57 = vpop.f32.mrf.mxu0 }
 0x115   : > { %v597_v59 = vmax.f32 %v545_v55, 0.0  ;;  %v617_v63 = vpack.c.bf16 %v599_v56, %v598_v60  ;;  %v566_v3 = vadd.f32 %v1093_v57, %v1440_v28 }
 0x116   : > { %v557_v61 = vpop.f32.mrf.mxu0 }
 0x117   : > { %v616_v62 = vpack.c.bf16 %v597_v59, %v596_v58  ;;  %v558_v1 = vadd.f32 %v1440_v28, %v557_v61  ;;  %v602_v9 = vmax.f32 %v566_v3, 0.0 }
 0x118   : > { %v1094_v0 = vpop.f32.mrf.mxu0 }
 0x119   : > { %v569_v2 = vadd.f32 %v1094_v0, %v1440_v28  ;;  %1135 = vmatprep.mubr.bf16.mxu1 %v616_v62  ;;  %v600_v7 = vmax.f32 %v558_v1, 0.0 }
 0x11a   : > { %v560_v4 = vpop.f32.mrf.mxu0  ;;  %1136 = vmatmul.mubr.bf16.gmra.mxu1 %v617_v63 }
 0x11b   : > { %v561_v5 = vadd.f32 %v1440_v28, %v560_v4  ;;  %v603_v6 = vmax.f32 %v569_v2, 0.0 }
 0x11d   : > { %v601_v8 = vmax.f32 %v561_v5, 0.0  ;;  %v619_v11 = vpack.c.bf16 %v603_v6, %v602_v9 }
 0x11f   : > { %v618_v10 = vpack.c.bf16 %v601_v8, %v600_v7 }
 0x121   : > { %1139 = vmatprep.mubr.bf16.mxu1 %v618_v10 }
 0x122   : > { %1140 = vmatmul.mubr.bf16.gmra.mxu1 %v619_v11 }
 0x1aa   : > { %v1113_v13 = vpop.f32.mrf.mxu0 }
 0x1ab   : > { %v734_v14 = vadd.f32 %v1113_v13, %v1480_v12 }
 0x1ac   : > { %v725_v28 = vpop.f32.mrf.mxu0 }
 0x1ad   : > { %854 = vst [vmem:[%s1483_s26 + $0x10] sm:$0xff] %v734_v14  ;;  %v726_v15 = vadd.f32 %v1480_v12, %v725_v28 }
 0x1ae   : > { %v1114_v16 = vpop.f32.mrf.mxu0 }
 0x1af   : > { %852 = vst [vmem:[%s1483_s26] sm:$0xff] %v726_v15  ;;  %v737_v17 = vadd.f32 %v1114_v16, %v1480_v12 }
 0x1b0   : > { %v728_v18 = vpop.f32.mrf.mxu0 }
 0x1b1   : > { %855 = vst [vmem:[%s1483_s26 + $0x18] sm:$0xff] %v737_v17  ;;  %v729_v19 = vadd.f32 %v1480_v12, %v728_v18 }
 0x1b2   : > { %v1117_v20 = vpop.f32.mrf.mxu1 }
 0x1b3   : > { %853 = vst [vmem:[%s1483_s26 + $0x8] sm:$0xff] %v729_v19  ;;  %v750_v21 = vadd.f32 %v1117_v20, %v1480_v12 }
 0x1b4   : > { %v741_v22 = vpop.f32.mrf.mxu1 }
 0x1b5   : > { %858 = vst [vmem:[%s1483_s26 + $0x30] sm:$0xff] %v750_v21  ;;  %v742_v23 = vadd.f32 %v1480_v12, %v741_v22 }
 0x1b6   : > { %v1118_v24 = vpop.f32.mrf.mxu1 }
 0x1b7   : > { %856 = vst [vmem:[%s1483_s26 + $0x20] sm:$0xff] %v742_v23  ;;  %v753_v25 = vadd.f32 %v1118_v24, %v1480_v12 }
 0x1b8   : > { %v744_v26 = vpop.f32.mrf.mxu1 }
 0x1b9   : > { %859 = vst [vmem:[%s1483_s26 + $0x38] sm:$0xff] %v753_v25  ;;  %v745_v27 = vadd.f32 %v1480_v12, %v744_v26 }
 0x1ba   : > { %v1121_v29 = vpop.f32.mrf.mxu1 }
 0x1bb   : > { %857 = vst [vmem:[%s1483_s26 + $0x28] sm:$0xff] %v745_v27  ;;  %v766_v30 = vadd.f32 %v1121_v29, %v1480_v12 }
 0x1bc   : > { %v757_v31 = vpop.f32.mrf.mxu1 }
 0x1bd   : > { %862 = vst [vmem:[%s1483_s26 + $0x50] sm:$0xff] %v766_v30  ;;  %v758_v32 = vadd.f32 %v1480_v12, %v757_v31 }
 0x1be   : > { %v1122_v33 = vpop.f32.mrf.mxu1 }
 0x1bf   : > { %860 = vst [vmem:[%s1483_s26 + $0x40] sm:$0xff] %v758_v32  ;;  %v769_v34 = vadd.f32 %v1122_v33, %v1480_v12 }
 0x1c0   : > { %v760_v35 = vpop.f32.mrf.mxu1 }
 0x1c1   : > { %863 = vst [vmem:[%s1483_s26 + $0x58] sm:$0xff] %v769_v34  ;;  %v761_v36 = vadd.f32 %v1480_v12, %v760_v35 }
 0x1c2   : > { %v1125_v37 = vpop.f32.mrf.mxu1 }
 0x1c3   : > { %861 = vst [vmem:[%s1483_s26 + $0x48] sm:$0xff] %v761_v36  ;;  %v782_v38 = vadd.f32 %v1125_v37, %v1480_v12 }
 0x1c4   : > { %v773_v39 = vpop.f32.mrf.mxu1 }
 0x1c5   : > { %866 = vst [vmem:[%s1483_s26 + $0x70] sm:$0xff] %v782_v38  ;;  %v774_v40 = vadd.f32 %v1480_v12, %v773_v39 }
 0x1c6   : > { %v1126_v41 = vpop.f32.mrf.mxu1 }
 0x1c7   : > { %864 = vst [vmem:[%s1483_s26 + $0x60] sm:$0xff] %v774_v40  ;;  %v785_v42 = vadd.f32 %v1126_v41, %v1480_v12 }
 0x1c8   : > { %v776_v43 = vpop.f32.mrf.mxu1 }
 0x1c9   : > { %867 = vst [vmem:[%s1483_s26 + $0x78] sm:$0xff] %v785_v42  ;;  %v777_v44 = vadd.f32 %v1480_v12, %v776_v43 }
 0x1ca   : > { %v1129_v45 = vpop.f32.mrf.mxu1 }
 0x1cb   : > { %865 = vst [vmem:[%s1483_s26 + $0x68] sm:$0xff] %v777_v44  ;;  %v798_v46 = vadd.f32 %v1129_v45, %v1480_v12 }
 0x1cc   : > { %v789_v47 = vpop.f32.mrf.mxu1 }
 0x1cd   : > { %870 = vst [vmem:[%s1483_s26 + $0x90] sm:$0xff] %v798_v46  ;;  %v790_v48 = vadd.f32 %v1480_v12, %v789_v47 }
 0x1ce   : > { %v1130_v49 = vpop.f32.mrf.mxu1 }
 0x1cf   : > { %868 = vst [vmem:[%s1483_s26 + $0x80] sm:$0xff] %v790_v48  ;;  %v801_v50 = vadd.f32 %v1130_v49, %v1480_v12 }
 0x1d0   : > { %v792_v51 = vpop.f32.mrf.mxu1 }
 0x1d1   : > { %871 = vst [vmem:[%s1483_s26 + $0x98] sm:$0xff] %v801_v50  ;;  %v793_v52 = vadd.f32 %v1480_v12, %v792_v51 }
 0x1d2   : > { %v1133_v53 = vpop.f32.mrf.mxu1 }
 0x1d3   : > { %869 = vst [vmem:[%s1483_s26 + $0x88] sm:$0xff] %v793_v52  ;;  %v814_v54 = vadd.f32 %v1133_v53, %v1480_v12 }
 0x1d4   : > { %v805_v55 = vpop.f32.mrf.mxu1 }
 0x1d5   : > { %874 = vst [vmem:[%s1483_s26 + $0xb0] sm:$0xff] %v814_v54  ;;  %v806_v56 = vadd.f32 %v1480_v12, %v805_v55 }
 0x1d6   : > { %v1134_v57 = vpop.f32.mrf.mxu1 }
 0x1d7   : > { %872 = vst [vmem:[%s1483_s26 + $0xa0] sm:$0xff] %v806_v56  ;;  %v817_v58 = vadd.f32 %v1134_v57, %v1480_v12 }
 0x1d8   : > { %v808_v59 = vpop.f32.mrf.mxu1 }
 0x1d9   : > { %875 = vst [vmem:[%s1483_s26 + $0xb8] sm:$0xff] %v817_v58  ;;  %v809_v60 = vadd.f32 %v1480_v12, %v808_v59 }
 0x1da   : > { %v1137_v61 = vpop.f32.mrf.mxu1 }
 0x1db   : > { %873 = vst [vmem:[%s1483_s26 + $0xa8] sm:$0xff] %v809_v60  ;;  %v830_v62 = vadd.f32 %v1137_v61, %v1480_v12 }
 0x1dc   : > { %v821_v63 = vpop.f32.mrf.mxu1 }
 0x1dd   : > { %878 = vst [vmem:[%s1483_s26 + $0xd0] sm:$0xff] %v830_v62  ;;  %v822_v0 = vadd.f32 %v1480_v12, %v821_v63 }
 0x1de   : > { %v1138_v1 = vpop.f32.mrf.mxu1 }
 0x1df   : > { %876 = vst [vmem:[%s1483_s26 + $0xc0] sm:$0xff] %v822_v0  ;;  %v833_v2 = vadd.f32 %v1138_v1, %v1480_v12 }
 0x1e0   : > { %v824_v3 = vpop.f32.mrf.mxu1 }
 0x1e1   : > { %879 = vst [vmem:[%s1483_s26 + $0xd8] sm:$0xff] %v833_v2  ;;  %v825_v4 = vadd.f32 %v1480_v12, %v824_v3 }
 0x1e2   : > { %v1141_v5 = vpop.f32.mrf.mxu1 }
 0x1e3   : > { %877 = vst [vmem:[%s1483_s26 + $0xc8] sm:$0xff] %v825_v4  ;;  %v846_v6 = vadd.f32 %v1141_v5, %v1480_v12 }
 0x1e4   : > { %v837_v7 = vpop.f32.mrf.mxu1 }
 0x1e5   : > { %882 = vst [vmem:[%s1483_s26 + $0xf0] sm:$0xff] %v846_v6  ;;  %v838_v8 = vadd.f32 %v1480_v12, %v837_v7 }
 0x1e6   : > { %v1142_v9 = vpop.f32.mrf.mxu1 }
 0x1e7   : > { %880 = vst [vmem:[%s1483_s26 + $0xe0] sm:$0xff] %v838_v8  ;;  %v849_v10 = vadd.f32 %v1142_v9, %v1480_v12 }
 0x1e8   : > { %v840_v11 = vpop.f32.mrf.mxu1 }
 0x1e9   : > { %883 = vst [vmem:[%s1483_s26 + $0xf8] sm:$0xff] %v849_v10  ;;  %v841_v13 = vadd.f32 %v1480_v12, %v840_v11 }
 0x1eb   : > { %881 = vst [vmem:[%s1483_s26 + $0xe8] sm:$0xff] %v841_v13 }
 0x1ec   : > { %1239 = shalt.err (!%p1236_p3)
}
 0x1ed   : > { %s1240_s14 = scalar_lea.hbm %s1550_s9, 4096  ;;  %s1244_s17 = scalar_lea.hbm %s1604_s5, 8192 }
 0x1ee   : > { %p1241_p4 = scmp.ne.s32.totalorder %s1550_s9, %s1240_s14  ;;  %p1245_p9 = scmp.lt.s32.totalorder %s1550_s9, %s1604_s5 }
 0x1ef   : > { %p1246_p10 = scmp.lt.s32.totalorder %s1244_s17, %s1240_s14 }
 0x1f0   : > { %p1242_p7 = pnand %p1241_p4, %p1359_p5 }
 0x1f1   : > { %p1247_p11 = por %p1246_p10, %p1245_p9 }
 0x1f2   : > { %p1243_p8 = pneg %p1242_p7 }
 0x1f4   : > { %p1248_p12 = pnand %p1247_p11, %p1243_p8 }
 0x1f6   : > { %1251 = shalt.err (!%p1248_p12)
}
 0x1f7   : > { %s1289_s26 = smov 128   ;;  %s1290_s30 = smov 8  }
 0x1f8   : > { %1159 = dma.vmem_to_hbm [thread:$0]  (%p1359_p5), %s1552_s6, 4096, %s1550_s9, %s1559_s22, %s1289_s26, %s1289_s26, %s1290_s30  }
 0x1f9 PF: > { %p1165_p13 = scmp.ge.s32.totalorder %s1286_s21, 2  ;;  %s913_s7 = sand.u32 1, %s1274_s18  }
 0x1fa   : > { %s914_s8 = scalar_lea.sflag [#allocation3], %s913_s7 }
 0x1fb   : > { %p1162_p0 = pnand %p1165_p13, %p1363_p6 }
 0x1fd   : > { %p1163_p1 = pneg %p1162_p0 }
 0x1ff   : > { %1269 = dma.done.wait (%p1163_p1), %s914_s8, 4096  }
 0x200   : > { %1271 = vsyncadd (%p1163_p1), %s914_s8, 4294963200  ;;  %p15_p2 = scmp.ge.s32.totalorder %s1346_s24, 4   ;;  %s1607_s18 = smov %s1278_s19 }
 0x201   : > { %s1608_s19 = smov %s1282_s20  ;;  %s1609_s20 = smov %s1357_s27 }
 0x202   : > { %s1610_s21 = smov %s1346_s24  ;;  %17 = sbr.rel (!%p15_p2) target bundleno = 3 (0x3), region = 75 }
 0x207   :  { %919 = vsyncpa [#allocation3], 1 }
 0x208   :  { %921 = vsyncpa [#allocation3 + $0x1], 1 }

</bundles_post_ra>
